<compile_context>
chip_gen: v6e
topology: v6e:2x2x1
jax: 0.10.0
libtpu: 0.0.40
codegen_flags: <defaults>
</compile_context>

<pallas_src>
import jax
import jax.numpy as jnp
from jax.experimental import pallas as pl
from jax.experimental.pallas import tpu as pltpu


# --------------------------------------------------------------------------- kernel


def _rope_kernel(cos2_ref, sin2_ref, pdeint_ref, pswap_ref, x_ref, o_ref):
    """Rotate one (tile_s, head_dim) slab belonging to a single (batch, head)."""
    rot = cos2_ref.shape[-1]  # rotary_dim (static)
    dh = x_ref.shape[-1]      # head_dim   (static)

    x_rot = (x_ref[...] if rot == dh else x_ref[:, :rot]).astype(jnp.float32)

    # De-interleave via constant 0/1 permutation matmuls on the (otherwise idle) MXU:
    #   z  = [x_even | x_odd],   zr = [x_odd | x_even]
    z = jnp.dot(x_rot, pdeint_ref[...], preferred_element_type=jnp.float32,
                precision=jax.lax.Precision.HIGHEST)
    zr = jnp.dot(x_rot, pswap_ref[...], preferred_element_type=jnp.float32,
                 precision=jax.lax.Precision.HIGHEST)

    # cos2 = [cos | cos],  sin2 = [-sin | sin]  (sign pre-folded in the wrapper), so:
    #   out[:, :r/2]  = x_even*cos - x_odd*sin
    #   out[:, r/2:r] = x_odd*cos  + x_even*sin
    out_rot = z * cos2_ref[...] + zr * sin2_ref[...]

    if rot == dh:
        o_ref[...] = out_rot.astype(o_ref.dtype)  # single lane-dense full-block store
    else:
        # partial rotary application: pass the trailing lanes through untouched
        o_ref[...] = jnp.concatenate(
            [out_rot.astype(o_ref.dtype), x_ref[:, rot:]], axis=-1)


# --------------------------------------------------------------------------- wrapper


def _freq_tables(seq_len: int, rot_dim: int, base: int):
    """cos/sin tables exactly as the PyTorch `_build_cache` builds them."""
    theta = 1.0 / (base ** (jnp.arange(0, rot_dim, 2, dtype=jnp.float32) / rot_dim))
    t = jnp.arange(seq_len, dtype=jnp.float32)[:, None]
    freqs = t * theta                      # (seq_len, rot_dim // 2)
    return jnp.cos(freqs), jnp.sin(freqs)


def _deinterleave_matrices(rot_dim: int):
    """Constant 0/1 matrices:  x @ pd = [x_even | x_odd],  x @ ps = [x_odd | x_even]."""
    half = rot_dim // 2
    rows = jnp.arange(rot_dim)
    col_deint = jnp.where(rows % 2 == 0, rows // 2, half + rows // 2)
    col_swap = jnp.where(rows % 2 == 0, half + rows // 2, rows // 2)
    pd = jax.nn.one_hot(col_deint, rot_dim, dtype=jnp.float32)
    ps = jax.nn.one_hot(col_swap, rot_dim, dtype=jnp.float32)
    return pd, ps


def _apply_rotary_pallas(x, cos2, sin2, pd, ps, rot_dim: int, *, tile_s: int = 512):
    """x: (B, H, S, Dh).  cos2/sin2: (S, rot_dim).  Returns rotated x, same shape/dtype."""
    B, H, S, Dh = x.shape
    n_bh = B * H
    xf = x.reshape(n_bh, S, Dh)            # free reshape (merge leading dims)

    tile = S if S <= tile_s else tile_s    # tile_s is a multiple of 8; S==tile covers small S
    n_s = pl.cdiv(S, tile)

    out = pl.pallas_call(
        _rope_kernel,
        out_shape=jax.ShapeDtypeStruct((n_bh, S, Dh), x.dtype),
        grid_spec=pltpu.PrefetchScalarGridSpec(
            num_scalar_prefetch=0,
            grid=(n_s, n_bh),              # seq tiles outer, batch*heads inner
            in_specs=[
                # tables: depend only on the seq tile -> stay VMEM-resident across n
                pl.BlockSpec((tile, rot_dim), lambda s, n: (s, 0)),
                pl.BlockSpec((tile, rot_dim), lambda s, n: (s, 0)),
                # constant permutation matrices: fully resident
                pl.BlockSpec((rot_dim, rot_dim), lambda s, n: (0, 0)),
                pl.BlockSpec((rot_dim, rot_dim), lambda s, n: (0, 0)),
                # streamed tensor
                pl.BlockSpec((None, tile, Dh), lambda s, n: (n, s, 0)),
            ],
            out_specs=pl.BlockSpec((None, tile, Dh), lambda s, n: (n, s, 0)),
        ),
        compiler_params=pltpu.CompilerParams(
            dimension_semantics=("parallel", "arbitrary"),
            vmem_limit_bytes=32 * 1024 * 1024,   # small footprint; safe on v5e/v6e/v7x
        ),
    )(cos2, sin2, pd, ps, xf)
    return out.reshape(B, H, S, Dh)


def rotary_embedding(q, k, *, dim: int, base: int = 10000):
    """Pallas equivalent of RotaryEmbedding.forward(q, k) with q_pos = k_pos = None."""
    *_, q_len, head_dim = q.shape
    k_len = k.shape[-2]
    rot_dim = min(head_dim, dim)
    # The PyTorch module only broadcasts correctly when dim <= head_dim.
    assert dim <= head_dim, "RotaryEmbedding requires dim <= head_dim"
    assert rot_dim % 2 == 0, "rotary dim must be even"

    max_len = max(q_len, k_len)
    cos, sin = _freq_tables(max_len, rot_dim, base)          # (max_len, rot_dim//2)
    cos2 = jnp.concatenate([cos, cos], axis=-1)              # (max_len, rot_dim)
    sin2 = jnp.concatenate([-sin, sin], axis=-1)             # sign folded into the table
    pd, ps = _deinterleave_matrices(rot_dim)

    q_out = _apply_rotary_pallas(q, cos2[:q_len], sin2[:q_len], pd, ps, rot_dim)
    k_out = _apply_rotary_pallas(k, cos2[:k_len], sin2[:k_len], pd, ps, rot_dim)
    return q_out, k_out


# --------------------------------------------------------------------------- reference & test


def _reference_rotary(x, dim: int, base: int):
    """Pure-JAX transcription of the PyTorch forward (q_pos=None path) for one tensor."""
    *_, seq_len, head_dim = x.shape
    rot = min(head_dim, dim)
    theta = 1.0 / (base ** (jnp.arange(0, dim, 2, dtype=jnp.float32) / dim))
    t = jnp.arange(seq_len, dtype=jnp.float32)[:, None]
    freqs = t * theta
    cos, sin = jnp.cos(freqs), jnp.sin(freqs)                # (seq, rot//2)
    x_rot, x_pass = x[..., :rot], x[..., rot:]
    xe, xo = x_rot[..., 0::2], x_rot[..., 1::2]
    out_rot = jnp.concatenate([xe * cos - xo * sin, xe * sin + xo * cos], axis=-1)
    return jnp.concatenate([out_rot, x_pass], axis=-1)


if __name__ == "__main__":
    B, H, Sq, Sk, Dh = 2, 4, 8, 16, 32
    base = 10000

    key = jax.random.PRNGKey(0)
    kq, kk = jax.random.split(key)
    q = jax.random.normal(kq, (B, H, Sq, Dh), dtype=jnp.float32)
    k = jax.random.normal(kk, (B, H, Sk, Dh), dtype=jnp.float32)

    # Full rotary (dim == head_dim)
    dim = 32
    q_out, k_out = rotary_embedding(q, k, dim=dim, base=base)
    q_out, k_out = jax.block_until_ready((q_out, k_out))
    assert q_out.shape == q.shape and q_out.dtype == q.dtype
    assert k_out.shape == k.shape and k_out.dtype == k.dtype
    # MXU-based permutation under HIGHEST precision is near-exact; 1e-4 comfortably
    # distinguishes a correct kernel from any low-precision fallback.
    assert jnp.allclose(q_out, _reference_rotary(q, dim, base), atol=1e-4, rtol=1e-4)
    assert jnp.allclose(k_out, _reference_rotary(k, dim, base), atol=1e-4, rtol=1e-4)

    # Partial rotary (dim < head_dim): trailing lanes pass through unchanged
    dim_p = 16
    q_out_p, k_out_p = rotary_embedding(q, k, dim=dim_p, base=base)
    q_out_p, k_out_p = jax.block_until_ready((q_out_p, k_out_p))
    assert jnp.allclose(q_out_p, _reference_rotary(q, dim_p, base), atol=1e-4, rtol=1e-4)
    assert jnp.allclose(k_out_p, _reference_rotary(k, dim_p, base), atol=1e-4, rtol=1e-4)

    print("KERNEL_OK")
</pallas_src>

<mosaic_0001>
module attributes {stable_mosaic.version = 11 : i64} {
  func.func @_rope_kernel(%arg0: i32, %arg1: i32, %arg2: memref<8x32xf32, #tpu.memory_space<vmem>>, %arg3: memref<8x32xf32, #tpu.memory_space<vmem>>, %arg4: memref<32x32xf32, #tpu.memory_space<vmem>>, %arg5: memref<32x32xf32, #tpu.memory_space<vmem>>, %arg6: memref<1x8x32xf32, #tpu.memory_space<vmem>>, %arg7: memref<1x8x32xf32, #tpu.memory_space<vmem>>) attributes {dimension_semantics = [#tpu.dimension_semantics<parallel>, #tpu.dimension_semantics<arbitrary>], iteration_bounds = array<i64: 1, 8>, scalar_prefetch = 0 : i64, scratch_operands = 0 : i64, tpu.core_type = #tpu.core_type<tc>, window_params = [{transform_indices = @transform_0, window_bounds = array<i64: 8, 32>}, {transform_indices = @transform_1, window_bounds = array<i64: 8, 32>}, {pipeline_mode = #tpu.pipeline_mode<synchronous>, transform_indices = @transform_2, window_bounds = array<i64: 32, 32>}, {pipeline_mode = #tpu.pipeline_mode<synchronous>, transform_indices = @transform_3, window_bounds = array<i64: 32, 32>}, {transform_indices = @transform_4, window_bounds = array<i64: 1, 8, 32>}, {transform_indices = @transform_5, window_bounds = array<i64: 1, 8, 32>}]} {
    %c0 = arith.constant 0 : index
    %c0_0 = arith.constant 0 : index
    %c0_1 = arith.constant 0 : index
    %0 = vector.load %arg6[%c0, %c0_0, %c0_1] : memref<1x8x32xf32, #tpu.memory_space<vmem>>, vector<1x8x32xf32>
    %1 = vector.shape_cast %0 : vector<1x8x32xf32> to vector<8x32xf32>
    %c0_2 = arith.constant 0 : index
    %c0_3 = arith.constant 0 : index
    %2 = vector.load %arg4[%c0_2, %c0_3] : memref<32x32xf32, #tpu.memory_space<vmem>>, vector<32x32xf32>
    %cst = arith.constant dense<0.000000e+00> : vector<8x32xf32>
    %3 = tpu.matmul %1, %2, %cst {dimension_numbers = #tpu.dot_dimension_numbers<[1], [0], [0], [1], [0, 0, 1, 1], [], []>, precision = #tpu.contract_precision<fp32>} : vector<8x32xf32>, vector<32x32xf32>, vector<8x32xf32> -> vector<8x32xf32>
    %c0_4 = arith.constant 0 : index
    %c0_5 = arith.constant 0 : index
    %4 = vector.load %arg5[%c0_4, %c0_5] : memref<32x32xf32, #tpu.memory_space<vmem>>, vector<32x32xf32>
    %cst_6 = arith.constant dense<0.000000e+00> : vector<8x32xf32>
    %5 = tpu.matmul %1, %4, %cst_6 {dimension_numbers = #tpu.dot_dimension_numbers<[1], [0], [0], [1], [0, 0, 1, 1], [], []>, precision = #tpu.contract_precision<fp32>} : vector<8x32xf32>, vector<32x32xf32>, vector<8x32xf32> -> vector<8x32xf32>
    %c0_7 = arith.constant 0 : index
    %c0_8 = arith.constant 0 : index
    %6 = vector.load %arg2[%c0_7, %c0_8] : memref<8x32xf32, #tpu.memory_space<vmem>>, vector<8x32xf32>
    %7 = arith.mulf %3, %6 : vector<8x32xf32>
    %c0_9 = arith.constant 0 : index
    %c0_10 = arith.constant 0 : index
    %8 = vector.load %arg3[%c0_9, %c0_10] : memref<8x32xf32, #tpu.memory_space<vmem>>, vector<8x32xf32>
    %9 = arith.mulf %5, %8 : vector<8x32xf32>
    %10 = arith.addf %7, %9 : vector<8x32xf32>
    %c0_11 = arith.constant 0 : index
    %c0_12 = arith.constant 0 : index
    %c0_13 = arith.constant 0 : index
    %11 = vector.load %arg7[%c0_11, %c0_12, %c0_13] : memref<1x8x32xf32, #tpu.memory_space<vmem>>, vector<1x8x32xf32>
    %12 = vector.shape_cast %11 : vector<1x8x32xf32> to vector<8x32xf32>
    %13 = vector.shape_cast %10 : vector<8x32xf32> to vector<1x8x32xf32>
    tpu.vector_store %arg7[%c0_11, %c0_12, %c0_13], %13 {strides = array<i32>} : memref<1x8x32xf32, #tpu.memory_space<vmem>>, vector<1x8x32xf32>,
    return
  }
  func.func @transform_0(%arg0: i32, %arg1: i32) -> (i32, i32) {
    %c0_i32 = arith.constant 0 : i32
    %c0_i32_0 = arith.constant 0 : i32
    return %arg0, %c0_i32 : i32, i32
  }
  func.func @transform_1(%arg0: i32, %arg1: i32) -> (i32, i32) {
    %c0_i32 = arith.constant 0 : i32
    %c0_i32_0 = arith.constant 0 : i32
    return %arg0, %c0_i32 : i32, i32
  }
  func.func @transform_2(%arg0: i32, %arg1: i32) -> (i32, i32) {
    %c0_i32 = arith.constant 0 : i32
    %c0_i32_0 = arith.constant 0 : i32
    %c0_i32_1 = arith.constant 0 : i32
    return %c0_i32, %c0_i32_0 : i32, i32
  }
  func.func @transform_3(%arg0: i32, %arg1: i32) -> (i32, i32) {
    %c0_i32 = arith.constant 0 : i32
    %c0_i32_0 = arith.constant 0 : i32
    %c0_i32_1 = arith.constant 0 : i32
    return %c0_i32, %c0_i32_0 : i32, i32
  }
  func.func @transform_4(%arg0: i32, %arg1: i32) -> (i32, i32, i32) {
    %c0_i32 = arith.constant 0 : i32
    %c0_i32_0 = arith.constant 0 : i32
    return %arg1, %arg0, %c0_i32 : i32, i32, i32
  }
  func.func @transform_5(%arg0: i32, %arg1: i32) -> (i32, i32, i32) {
    %c0_i32 = arith.constant 0 : i32
    %c0_i32_0 = arith.constant 0 : i32
    return %arg1, %arg0, %c0_i32 : i32, i32, i32
  }
}

</mosaic_0001>

<bundles_post_ra>
// kernel: tpu_custom_call.1
= control target key start
LH: loop header
LB: loop body
LE: loop exit
PB: predicated region body
PF: predicated region fallthrough
CT: control target
= control target key end

     0   :  { %s2423_s0 = inlined_call_operand.hbm [shape: f32[8,32], index: 0, kind: input, shape index: {}]   ;;  %s2424_s1 = inlined_call_operand.hbm [shape: f32[8,32], index: 1, kind: input, shape index: {}]   ;;  %s2425_s2 = inlined_call_operand.hbm [shape: f32[32,32], index: 2, kind: input, shape index: {}]   ;;  %s2426_s3 = inlined_call_operand.hbm [shape: f32[32,32], index: 3, kind: input, shape index: {}]   ;;  %s2427_s4 = inlined_call_operand.hbm [shape: f32[8,8,32], index: 4, kind: input, shape index: {}]   ;;  %s2428_s5 = inlined_call_operand.hbm [shape: f32[8,8,32], index: 5, kind: output, shape index: {}]  }
   0x1   :  { %2431 = sst [smem:[#allocation17_spill]] %s2423_s0 }
   0x2   :  { %2432 = sst [smem:[#allocation18_spill]] %s2424_s1 }
   0x3   :  { %10 = vsyncpa [#allocation3], 0 }
   0x4   :  { %11 = vsyncpa [#allocation6], 0 }
   0x5   :  { %12 = vsyncpa [#allocation9], 0 }
   0x6   :  { %13 = vsyncpa [#allocation4], 0 }
   0x7   :  { %15 = vsyncpa [#allocation4 + $0x1], 0  ;;  %s2035_s18 = smov 0   ;;  %s2037_s19 = smov 0  }
   0x8   :  { %s2039_s20 = smov 0   ;;  %s2041_s21 = smov 0  }
   0x9   :  { %s2043_s22 = smov 0   ;;  %s2045_s23 = smov 0  }
   0xa LB: > { %s2066_s24 = sadd.s32 4294967295, %s1993_s23   ;;  %p1451_p0 = scmp.ge.s32.totalorder %s1993_s23, 1  ;;  %s1993_s23 = sphi %s2045_s23, %s21_s23   ;;  %s1989_s22 = sphi %s2043_s22, %s2455_s22   ;;  %s1985_s21 = sphi %s2041_s21, %s2454_s21   ;;  %s1981_s20 = sphi %s2039_s20, %s2453_s20   ;;  %s1977_s19 = sphi %s2037_s19, %s2452_s19   ;;  %s1973_s18 = sphi %s2035_s18, %s2451_s18  }
   0xb   : > { %p2429_p1 = scmp.eq.s32.totalorder %s2066_s24, 0  ;;  %p188_p3 = scmp.lt.s32.totalorder %s1993_s23, 9 }
   0xc   : > { %s1995_s26 = smov [#allocation2]   ;;  %s1996_s28 = smov [#allocation5]  }
   0xd   : > { %p2072_p4 = pnand %p1451_p0, %p188_p3  ;;  %s203_s27 = sshll.u32 %s1995_s26, 4  ;;  %s204_s27 = int_to_ptr.vmem [resolvable:$true] %s203_s27 }
   0xe   : > { %s216_s29 = sshll.u32 %s1996_s28, 4  ;;  %s1997_s6 = smov [#allocation7]   ;;  %s217_s29 = int_to_ptr.vmem [resolvable:$true] %s216_s29 }
   0xf   : > { %s2433_s25 = scalar_select %p2072_p4, 1, 0 }
  0x10   : > { %p1682_p5 = pneg %p2072_p4  ;;  %s226_s7 = sshll.u32 %s1997_s6, 4  ;;  %s2084_s7 = int_to_ptr.vmem [resolvable:$true] %s226_s7 }
  0x11   : > { %s1780_s8 = scalar_lea.vmem %s204_s27, 128  ;;  %p1788_p11 = scmp.lt.s32.totalorder %s204_s27, %s204_s27 }
  0x12   : > { %p2080_p6 = pnand %p1682_p5, %p2429_p1  ;;  %p1781_p8 = scmp.ne.s32.totalorder %s204_s27, %s1780_s8 }
  0x13   : > { %p1789_p12 = scmp.lt.s32.totalorder %s1780_s8, %s1780_s8 }
  0x14   : > { %p1771_p7 = pneg %p2080_p6 }
  0x15   : > { %p1790_p13 = por %p1789_p12, %p1788_p11 }
  0x16   : > { %p1783_p9 = pnand %p1781_p8, %p1771_p7 }
  0x18   : > { %p1784_p10 = pneg %p1783_p9 }
  0x1a   : > { %p1791_p0 = pnand %p1790_p13, %p1784_p10 }
  0x1c   : > { %1794 = shalt.err (!%p1791_p0)
}
  0x1d   : > { %s2435_s0 = sld [smem:[#allocation17_spill]]  ;;  %s1806_s11 = scalar_lea.vmem %s217_s29, 128 }
  0x1e   : > { %p1807_p3 = scmp.ne.s32.totalorder %s217_s29, %s1806_s11  ;;  %p1814_p8 = scmp.lt.s32.totalorder %s217_s29, %s217_s29 }
  0x1f   : > { %p1815_p9 = scmp.lt.s32.totalorder %s1806_s11, %s1806_s11 }
  0x20   : > { %p1809_p5 = pnand %p1807_p3, %p1771_p7 }
  0x21   : > { %p1816_p1 = por %p1815_p9, %p1814_p8 }
  0x22   : > { %p1810_p2 = pneg %p1809_p5 }
  0x23   : > { %1685 = dma.hbm_to_vmem [thread:$0]  (!%p2080_p6), %s2435_s0, 128, %s204_s27, [#allocation3]  }
  0x24   : > { %p1817_p4 = pnand %p1816_p1, %p1810_p2 }
  0x26   : > { %1820 = shalt.err (!%p1817_p4)
}
  0x27   : > { %s2436_s1 = sld [smem:[#allocation18_spill]]  ;;  %s1832_s14 = scalar_lea.vmem %s2084_s7, 512 }
  0x28   : > { %p1833_p10 = scmp.ne.s32.totalorder %s2084_s7, %s1832_s14  ;;  %p1840_p13 = scmp.lt.s32.totalorder %s2084_s7, %s2084_s7 }
  0x29   : > { %p1841_p1 = scmp.lt.s32.totalorder %s1832_s14, %s1832_s14 }
  0x2a   : > { %p1835_p11 = pnand %p1833_p10, %p1771_p7 }
  0x2b   : > { %p1842_p2 = por %p1841_p1, %p1840_p13 }
  0x2c   : > { %p1836_p12 = pneg %p1835_p11 }
  0x2d   : > { %1688 = dma.hbm_to_vmem [thread:$0]  (!%p2080_p6), %s2436_s1, 128, %s217_s29, [#allocation6]  }
  0x2e   : > { %p1843_p4 = pnand %p1842_p2, %p1836_p12 }
  0x30   : > { %1846 = shalt.err (!%p1843_p4)
}
  0x31   : > { %s1998_s15 = smov 128   ;;  %s1999_s16 = smov 8  }
  0x32   : > { %1691 = dma.hbm_to_vmem [thread:$0]  (!%p2080_p6), %s2425_s2, 512, %s2084_s7, [#allocation6], %s1998_s15, %s1998_s15, %s1999_s16  }
  0x33   : > { %s2000_s27 = smov [#allocation8]  }
  0x34   : > { %s239_s28 = sshll.u32 %s2000_s27, 4  ;;  %s240_s28 = int_to_ptr.vmem [resolvable:$true] %s239_s28 }
  0x35   : > { %s1858_s29 = scalar_lea.vmem %s240_s28, 512  ;;  %p1866_p8 = scmp.lt.s32.totalorder %s240_s28, %s240_s28 }
  0x36   : > { %p1859_p0 = scmp.ne.s32.totalorder %s240_s28, %s1858_s29  ;;  %p1867_p9 = scmp.lt.s32.totalorder %s1858_s29, %s1858_s29 }
  0x38   : > { %p1861_p3 = pnand %p1859_p0, %p1771_p7  ;;  %p1868_p10 = por %p1867_p9, %p1866_p8 }
  0x3a   : > { %p1862_p5 = pneg %p1861_p3 }
  0x3c   : > { %p1869_p11 = pnand %p1868_p10, %p1862_p5 }
  0x3e   : > { %1872 = shalt.err (!%p1869_p11)
}
  0x3f   : > { %1694 = dma.hbm_to_vmem [thread:$0]  (!%p2080_p6), %s2426_s3, 512, %s240_s28, [#allocation9], %s1998_s15, %s1998_s15, %s1999_s16  }
  0x40   : > { %s1450_s7 = sadd.s32 4294967294, %s1993_s23   ;;  %s30_s30 = sadd.s32 1, %s1989_s22 }
  0x41   : > { %s136_s9 = sadd.s32 1, %s1981_s20  ;;  %p31_p7 = scmp.ge.s32.totalorder %s30_s30, 8 }
  0x42   : > { %p143_p12 = scmp.ne.s32.totalorder %s1981_s20, %s1977_s19  ;;  %p144_p13 = scmp.eq.s32.totalorder %s1993_s23, 0 }
  0x43   : > { %p149_p1 = scmp.ne.s32.totalorder %s1977_s19, %s1973_s18  ;;  %s2457_s30 = smov (%p31_p7, %s30_s30), 0 }
  0x44   : > { %p2135_p2 = por %p144_p13, %p143_p12  ;;  %p2438_p4 = scmp.eq.s32.totalorder %s2066_s24, 0 }
  0x45   : > { %s131_s12 = ssub.s32 %s1989_s22, %s2457_s30  ;;  %p2440_p0 = scmp.eq.s32.totalorder %s2066_s24, 7 }
  0x46   : > { %p2141_p6 = por %p2438_p4, %p149_p1  ;;  %p134_p5 = scmp.eq.s32.totalorder %s131_s12, 0 }
  0x47   : > { %p2149_p3 = por %p2440_p0, %p143_p12  ;;  %p181_p8 = scmp.eq.s32.totalorder %s1450_s7, 7 }
  0x48   : > { %p1707_p9 = scmp.lt.s32.totalorder %s1993_s23, 8  ;;  %s253_s14 = sand.u32 1, %s1993_s23  }
  0x49   : > { %s2156_s15 = scalar_select %p134_p5, %s1981_s20, %s136_s9  }
  0x4a   : > { %p2158_p10 = por %p181_p8, %p149_p1  ;;  %s255_s17 = sand.u32 1, %s1981_s20  }
  0x4b   : > { %s1458_s26 = sshll.u32 %s1989_s22, 7  ;;  %s1457_s27 = sshll.u32 %s255_s17, 3 }
  0x4c   : > { %s263_s6 = scalar_lea.hbm %s2427_s4, %s1458_s26  ;;  %p2169_p11 = pnand %p1707_p9, %p2135_p2 }
  0x4d   : > { %s257_s7 = scalar_lea.vmem [#allocation10], %s1457_s27  ;;  %s254_s12 = scalar_lea.sflag [#allocation3], %s253_s14 }
  0x4e   : > { %s265_s9 = sshll.u32 %s257_s7, 4  ;;  %p1875_p7 = pneg %p2169_p11  ;;  %s266_s9 = int_to_ptr.vmem [resolvable:$true] %s265_s9 }
  0x4f   : > { %s1886_s0 = scalar_lea.vmem %s266_s9, 128  ;;  %s2001_s17 = smov [#allocation10]  }
  0x50   : > { %p1887_p12 = scmp.ne.s32.totalorder %s266_s9, %s1886_s0  ;;  %s1891_s1 = sshll.u32 %s2001_s17, 4  ;;  %s1892_s1 = int_to_ptr.vmem [resolvable:$false] %s1891_s1 }
  0x51   : > { %s1893_s26 = scalar_lea.vmem %s1892_s1, 256  ;;  %p1894_p4 = scmp.lt.s32.totalorder %s266_s9, %s1892_s1 }
  0x52   : > { %p1889_p13 = pnand %p1887_p12, %p1875_p7  ;;  %p1895_p2 = scmp.lt.s32.totalorder %s1893_s26, %s1886_s0 }
  0x54   : > { %p1890_p1 = pneg %p1889_p13  ;;  %p1896_p0 = por %p1895_p2, %p1894_p4 }
  0x56   : > { %p1897_p5 = pnand %p1896_p0, %p1890_p1 }
  0x58   : > { %1900 = shalt.err (!%p1897_p5)
}
  0x59   : > { %1698 = dma.hbm_to_vmem [thread:$0]  (!%p2169_p11), %s263_s6, 128, %s266_s9, %s254_s12  }
  0x5a   : > { %p2444_p8 = scmp.ne.s32.totalorder %s2433_s25, 0 }
  0x5b   : > { %p2445_p9 = scmp.eq.s32.totalorder (!%p2444_p8), %s2066_s24, 0 }
  0x5c   : > { %274 = sbr.rel (%p2444_p8) target bundleno = 389 (0x185), region = 40 }
  0x61   : > { %1952 = dma.done.wait (%p2445_p9), [#allocation3], 128   ;;  %p2446_p7 = pmov %p2445_p9 }
  0x63   : > { %1954 = vsyncadd (%p2446_p7), [#allocation3], 4294967168  ;;  %p2447_p12 = pmov %p2446_p7 }
  0x64   : > { %p2448_p13 = pmov %p2446_p7 }
  0x65   : > { %1956 = dma.done.wait (%p2447_p12), [#allocation6], 640  }
  0x66   : > { %1958 = vsyncadd (%p2448_p13), [#allocation6], 4294966656  ;;  %p2449_p1 = pmov %p2446_p7 }
  0x68   : > { %1960 = dma.done.wait (%p2449_p1), [#allocation9], 512   ;;  %p2450_p11 = pmov %p2449_p1 }
  0x69   : > { %s292_s0 = sand.u32 1, %s2066_s24   ;;  %s294_s1 = sand.u32 1, %s1977_s19  }
  0x6a   : > { %1962 = vsyncadd (%p2450_p11), [#allocation9], 4294966784  ;;  %s2195_s25 = sshll.u32 %s294_s1, 3  ;;  %s293_s10 = scalar_lea.sflag [#allocation3], %s292_s0 }
  0x6b   : > { %s296_s14 = scalar_lea.vmem [#allocation10], %s2195_s25 }
  0x6c   : > { %1964 = dma.done.wait (%p2141_p6), %s293_s10, 128  }
  0x6d   : > { %1966 = vsyncadd (%p2141_p6), %s293_s10, 4294967168  ;;  %v2002_v0 = vmov 0.0   ;;  %vm2003_vm0 = vmmov 0   ;;  %vm328_vm1 = vcmask 261120   ;;  %v327_v1 = vld [vmem:[#allocation7 + $0x18] sm:$0xff]  ;;  %v326_v2 = vld [vmem:[#allocation7 + $0x10] sm:$0xff] }
  0x6e   : > { %1530 = vmatprep.subr.mxu0 %v2002_v0  ;;  %1541 = vmatprep.subr.mxu1 %v2002_v0  ;;  %v325_v3 = vld [vmem:[#allocation7 + $0x8] sm:$0xff]  ;;  %v2208_v4 = vand.u32 4294901760, %v327_v1  ;;  %v2210_v5 = vand.u32 4294901760, %v326_v2  ;;  %v324_v7 = vld [vmem:[#allocation7] sm:$0xff]  ;;  %v820_v32 = vld [vmem:[#allocation8 + $0x18] sm:$0xff]  ;;  %s1467_s24 = sshll.u32 %s1985_s21, 7 }
  0x6f   : > { %1538 = vmatprep.mubr.msk.f32.mxu0 %vm2003_vm0, %v2002_v0  ;;  %1549 = vmatprep.mubr.msk.f32.mxu1 %vm2003_vm0, %v2002_v0  ;;  %v2212_v6 = vand.u32 4294901760, %v325_v3  ;;  %v323_v8 = vld [vmem:[%s296_s14] sm:$0xff]  ;;  %v2214_v9 = vand.u32 4294901760, %v324_v7  ;;  %v2264_v33 = vand.u32 4294901760, %v820_v32  ;;  %v819_v34 = vld [vmem:[#allocation8 + $0x10] sm:$0xff]  ;;  %s322_s11 = scalar_lea.vmem [#allocation11], %s2195_s25  ;;  %s1325_s6 = scalar_lea.hbm %s2428_s5, %s1467_s24 }
  0x70   : > { %v330_v10 = vsel %vm328_vm1, %v323_v8, 0  ;;  %1531 = vmatpush3.msra.mxu0 %v2208_v4  ;;  %v437_v11 = vsub.f32 %v327_v1, %v2208_v4  ;;  %v444_v13 = vsub.f32 %v326_v2, %v2210_v5  ;;  %v818_v35 = vld [vmem:[#allocation8 + $0x8] sm:$0xff]  ;;  %v2271_v36 = vand.u32 4294901760, %v819_v34  ;;  %v817_v38 = vld [vmem:[#allocation8] sm:$0xff]  ;;  %s1327_s27 = sshll.u32 %s322_s11, 4  ;;  %s1313_s8 = scalar_lea.sflag [#allocation4], %s294_s1  ;;  %s1328_s27 = int_to_ptr.vmem [resolvable:$true] %s1327_s27 }
  0x71   : > { %v2219_v12 = vand.u32 4294901760, %v330_v10  ;;  %v2223_v14 = vsub.f32 %v325_v3, %v2212_v6  ;;  %1532 = vmatprep.subr.mxu0 %v2002_v0  ;;  %v2227_v15 = vsub.f32 %v324_v7, %v2214_v9  ;;  %v2276_v37 = vsub.f32 %v820_v32, %v2264_v33  ;;  %s1901_s7 = scalar_lea.vmem %s1328_s27, 128  ;;  %s2004_s21 = smov [#allocation11]  }
  0x72   : > { %1533 = vmatpush3.msra.mxu0 %v2210_v5  ;;  %v438_v16 = vand.u32 4294901760, %v437_v11  ;;  %v445_v18 = vand.u32 4294901760, %v444_v13  ;;  %v2279_v39 = vand.u32 4294901760, %v818_v35  ;;  %v2287_v40 = vsub.f32 %v819_v34, %v2271_v36  ;;  %p1902_p6 = scmp.ne.s32.totalorder %s1328_s27, %s1901_s7  ;;  %s1905_s9 = sshll.u32 %s2004_s21, 4  ;;  %s1906_s9 = int_to_ptr.vmem [resolvable:$false] %s1905_s9 }
  0x73   : > { %v2231_v17 = vsub.f32 %v330_v10, %v2219_v12  ;;  %v452_v19 = vand.u32 4294901760, %v2223_v14  ;;  %1534 = vmatprep.subr.mxu0 %v2002_v0  ;;  %v459_v20 = vand.u32 4294901760, %v2227_v15  ;;  %v2289_v41 = vand.u32 4294901760, %v817_v38  ;;  %s1907_s12 = scalar_lea.vmem %s1906_s9, 256  ;;  %p1908_p0 = scmp.lt.s32.totalorder %s1328_s27, %s1906_s9 }
  0x74   : > { %1535 = vmatpush3.msra.mxu0 %v2212_v6  ;;  %v439_v21 = vsub.f32 %v437_v11, %v438_v16  ;;  %v446_v23 = vsub.f32 %v444_v13, %v445_v18  ;;  %v927_v42 = vand.u32 4294901760, %v2276_v37  ;;  %v2296_v43 = vsub.f32 %v818_v35, %v2279_v39  ;;  %p1903_p4 = pnand %p1902_p6, %p2149_p3  ;;  %p1909_p5 = scmp.lt.s32.totalorder %s1907_s12, %s1901_s7 }
  0x75   : > { %v2238_v22 = vand.u32 4294901760, %v2231_v17  ;;  %v453_v24 = vsub.f32 %v2223_v14, %v452_v19  ;;  %1536 = vmatprep.subr.mxu0 %v2002_v0  ;;  %v460_v28 = vsub.f32 %v2227_v15, %v459_v20  ;;  %v2305_v44 = vsub.f32 %v817_v38, %v2289_v41 }
  0x76   : > { %1537 = vmatpush3.msra.mxu0 %v2214_v9  ;;  %v440_v25 = vand.u32 4294901760, %v439_v21  ;;  %v447_v27 = vand.u32 4294901760, %v446_v23  ;;  %v934_v45 = vand.u32 4294901760, %v2287_v40  ;;  %v928_v46 = vsub.f32 %v2276_v37, %v927_v42  ;;  %v1306_v23 = vld [vmem:[#allocation2] sm:$0xff]  ;;  %p1904_p2 = pneg %p1903_p4  ;;  %p1910_p8 = por %p1909_p5, %p1908_p0 }
  0x77   : > { %v404_v26 = vsub.f32 %v2231_v17, %v2238_v22  ;;  %1552 = vmatprep.subr.mxu0 %v2002_v0  ;;  %v454_v30 = vand.u32 4294901760, %v453_v24  ;;  %v461_v31 = vand.u32 4294901760, %v460_v28  ;;  %v941_v47 = vand.u32 4294901760, %v2296_v43 }
  0x78   : > { %1542 = vmatpush3.msra.mxu1 %v440_v25  ;;  %v935_v48 = vsub.f32 %v2287_v40, %v934_v45  ;;  %v948_v49 = vand.u32 4294901760, %v2305_v44  ;;  %v929_v50 = vand.u32 4294901760, %v928_v46  ;;  %v1308_v25 = vld [vmem:[#allocation5] sm:$0xff]  ;;  %p1911_p9 = pnand %p1910_p8, %p1904_p2 }
  0x79   : > { %v2249_v29 = vand.u32 4294901760, %v404_v26  ;;  %1543 = vmatprep.subr.mxu1 %v2002_v0  ;;  %v942_v51 = vsub.f32 %v2296_v43, %v941_v47 }
  0x7a   : > { %1544 = vmatpush3.msra.mxu1 %v447_v27  ;;  %v936_v52 = vand.u32 4294901760, %v935_v48  ;;  %v949_v53 = vsub.f32 %v2305_v44, %v948_v49 }
  0x7b   : > { %1539 = vmatmul.mubr.f32.vlgmr.msra.gmra.mxu0 %v2249_v29  ;;  %1545 = vmatprep.subr.mxu1 %v2002_v0  ;;  %v943_v54 = vand.u32 4294901760, %v942_v51 }
  0x7c   : > { %1553 = vmatpush3.msra.mxu0 %v437_v11  ;;  %1546 = vmatpush3.msra.mxu1 %v454_v30  ;;  %v950_v55 = vand.u32 4294901760, %v949_v53 }
  0x7d   : > { %1554 = vmatprep.subr.mxu0 %v2002_v0  ;;  %1547 = vmatprep.subr.mxu1 %v2002_v0 }
  0x7e   : > { %1555 = vmatpush3.msra.mxu0 %v444_v13  ;;  %1548 = vmatpush3.msra.mxu1 %v461_v31 }
  0x7f   : > { %1556 = vmatprep.subr.mxu0 %v2002_v0  ;;  %1550 = vmatmul.mubr.f32.vlgmr.msra.gmra.mxu1 %v2219_v12 }
  0x80   : > { %1557 = vmatpush3.msra.mxu0 %v2223_v14  ;;  %1563 = vmatprep.subr.mxu1 %v2002_v0 }
  0x81   : > { %1558 = vmatprep.subr.mxu0 %v2002_v0  ;;  %1560 = vmatprep.mubr.msk.f32.mxu0 %vm2003_vm0, %v2002_v0 }
  0x82   : > { %1559 = vmatpush3.msra.mxu0 %v2227_v15  ;;  %1564 = vmatpush3.msra.mxu1 %v2208_v4 }
  0x83   : > { %1561 = vmatmul.mubr.f32.vlgmr.msra.gmra.mxu0 %v2231_v17  ;;  %1565 = vmatprep.subr.mxu1 %v2002_v0 }
  0x84   : > { %1574 = vmatprep.subr.mxu0 %v2002_v0  ;;  %1566 = vmatpush3.msra.mxu1 %v2210_v5 }
  0x85   : > { %1575 = vmatpush3.msra.mxu0 %v438_v16  ;;  %1567 = vmatprep.subr.mxu1 %v2002_v0 }
  0x86   : > { %1576 = vmatprep.subr.mxu0 %v2002_v0  ;;  %1568 = vmatpush3.msra.mxu1 %v2212_v6 }
  0x87   : > { %1577 = vmatpush3.msra.mxu0 %v445_v18  ;;  %1569 = vmatprep.subr.mxu1 %v2002_v0 }
  0x88   : > { %1578 = vmatprep.subr.mxu0 %v2002_v0  ;;  %1570 = vmatpush3.msra.mxu1 %v2214_v9 }
  0x89   : > { %1571 = vmatprep.mubr.msk.f32.mxu1 %vm2003_vm0, %v2002_v0  ;;  %1579 = vmatpush3.msra.mxu0 %v452_v19 }
  0x8a   : > { %1572 = vmatmul.mubr.f32.vlgmr.msra.gmra.mxu1 %v2238_v22  ;;  %1580 = vmatprep.subr.mxu0 %v2002_v0 }
  0x8b   : > { %1585 = vmatprep.subr.mxu1 %v2002_v0  ;;  %1581 = vmatpush3.msra.mxu0 %v459_v20 }
  0x8c   : > { %1582 = vmatprep.mubr.msk.f32.mxu0 %vm2003_vm0, %v2002_v0  ;;  %1586 = vmatpush3.msra.mxu1 %v2208_v4 }
  0x8d   : > { %1583 = vmatmul.mubr.f32.vlgmr.msra.gmra.mxu0 %v2219_v12  ;;  %1587 = vmatprep.subr.mxu1 %v2002_v0 }
  0x8e   : > { %1596 = vmatprep.subr.mxu0 %v2002_v0  ;;  %1588 = vmatpush3.msra.mxu1 %v2210_v5 }
  0x8f   : > { %1597 = vmatpush3.msra.mxu0 %v2264_v33  ;;  %1589 = vmatprep.subr.mxu1 %v2002_v0 }
  0x90   : > { %1598 = vmatprep.subr.mxu0 %v2002_v0  ;;  %1590 = vmatpush3.msra.mxu1 %v2212_v6 }
  0x91   : > { %1599 = vmatpush3.msra.mxu0 %v2271_v36  ;;  %1591 = vmatprep.subr.mxu1 %v2002_v0 }
  0x92   : > { %1600 = vmatprep.subr.mxu0 %v2002_v0  ;;  %1592 = vmatpush3.msra.mxu1 %v2214_v9 }
  0x93   : > { %1593 = vmatprep.mubr.msk.f32.mxu1 %vm2003_vm0, %v2002_v0  ;;  %1601 = vmatpush3.msra.mxu0 %v2279_v39 }
  0x94   : > { %1594 = vmatmul.mubr.f32.vlgmr.msra.gmra.mxu1 %v2219_v12  ;;  %1602 = vmatprep.subr.mxu0 %v2002_v0 }
  0x95   : > { %1607 = vmatprep.subr.mxu1 %v2002_v0  ;;  %1603 = vmatpush3.msra.mxu0 %v2289_v41 }
  0x96   : > { %1608 = vmatpush3.msra.mxu1 %v929_v50  ;;  %1604 = vmatprep.mubr.msk.f32.mxu0 %vm2003_vm0, %v2002_v0 }
  0x97   : > { %1609 = vmatprep.subr.mxu1 %v2002_v0  ;;  %1618 = vmatprep.subr.mxu0 %v2002_v0 }
  0x98   : > { %1605 = vmatmul.mubr.f32.vlgmr.msra.gmra.mxu0 %v2249_v29  ;;  %1610 = vmatpush3.msra.mxu1 %v936_v52 }
  0x99   : > { %1619 = vmatpush3.msra.mxu0 %v2276_v37  ;;  %1611 = vmatprep.subr.mxu1 %v2002_v0 }
  0x9a   : > { %1620 = vmatprep.subr.mxu0 %v2002_v0  ;;  %1612 = vmatpush3.msra.mxu1 %v943_v54 }
  0x9b   : > { %1621 = vmatpush3.msra.mxu0 %v2287_v40  ;;  %1613 = vmatprep.subr.mxu1 %v2002_v0 }
  0x9c   : > { %1622 = vmatprep.subr.mxu0 %v2002_v0  ;;  %1614 = vmatpush3.msra.mxu1 %v950_v55 }
  0x9d   : > { %1615 = vmatprep.mubr.msk.f32.mxu1 %vm2003_vm0, %v2002_v0  ;;  %1623 = vmatpush3.msra.mxu0 %v2296_v43 }
  0x9e   : > { %1616 = vmatmul.mubr.f32.vlgmr.msra.gmra.mxu1 %v2219_v12  ;;  %1624 = vmatprep.subr.mxu0 %v2002_v0 }
  0x9f   : > { %1629 = vmatprep.subr.mxu1 %v2002_v0  ;;  %1625 = vmatpush3.msra.mxu0 %v2305_v44 }
  0xa0   : > { %1626 = vmatprep.mubr.msk.f32.mxu0 %vm2003_vm0, %v2002_v0  ;;  %1630 = vmatpush3.msra.mxu1 %v2264_v33 }
  0xa1   : > { %1627 = vmatmul.mubr.f32.vlgmr.msra.gmra.mxu0 %v2231_v17  ;;  %1631 = vmatprep.subr.mxu1 %v2002_v0 }
  0xa2   : > { %1640 = vmatprep.subr.mxu0 %v2002_v0  ;;  %1632 = vmatpush3.msra.mxu1 %v2271_v36 }
  0xa3   : > { %1641 = vmatpush3.msra.mxu0 %v927_v42  ;;  %1633 = vmatprep.subr.mxu1 %v2002_v0 }
  0xa4   : > { %1642 = vmatprep.subr.mxu0 %v2002_v0  ;;  %1634 = vmatpush3.msra.mxu1 %v2279_v39 }
  0xa5   : > { %1643 = vmatpush3.msra.mxu0 %v934_v45  ;;  %1635 = vmatprep.subr.mxu1 %v2002_v0 }
  0xa6   : > { %1644 = vmatprep.subr.mxu0 %v2002_v0  ;;  %1636 = vmatpush3.msra.mxu1 %v2289_v41 }
  0xa7   : > { %1637 = vmatprep.mubr.msk.f32.mxu1 %vm2003_vm0, %v2002_v0  ;;  %1645 = vmatpush3.msra.mxu0 %v941_v47 }
  0xa8   : > { %1638 = vmatmul.mubr.f32.vlgmr.msra.gmra.mxu1 %v2238_v22  ;;  %1646 = vmatprep.subr.mxu0 %v2002_v0 }
  0xa9   : > { %1651 = vmatprep.subr.mxu1 %v2002_v0  ;;  %1647 = vmatpush3.msra.mxu0 %v948_v49 }
  0xaa   : > { %1648 = vmatprep.mubr.msk.f32.mxu0 %vm2003_vm0, %v2002_v0  ;;  %1652 = vmatpush3.msra.mxu1 %v2264_v33 }
  0xab   : > { %1649 = vmatmul.mubr.f32.vlgmr.msra.gmra.mxu0 %v2219_v12  ;;  %1653 = vmatprep.subr.mxu1 %v2002_v0 }
  0xac   : > { %1659 = vmatprep.mubr.msk.f32.mxu1 %vm2003_vm0, %v2002_v0  ;;  %1654 = vmatpush3.msra.mxu1 %v2271_v36 }
  0xad   : > { %1655 = vmatprep.subr.mxu1 %v2002_v0 }
  0xae   : > { %1656 = vmatpush3.msra.mxu1 %v2279_v39 }
  0xaf   : > { %1657 = vmatprep.subr.mxu1 %v2002_v0 }
  0xb0   : > { %1658 = vmatpush3.msra.mxu1 %v2289_v41 }
  0xb1   : > { %1660 = vmatmul.mubr.f32.vlgmr.msra.gmra.mxu1 %v2219_v12 }
 0x13b   : > { %v407_v56 = vpop.f32.mrf.mxu0 }
 0x13d   : > { %v1540_v57 = vpop.f32.mrf.mxu0 }
 0x13f   : > { %v498_v58 = vpop.f32.mrf.mxu1 }
 0x140   : > { %v499_v10 = vadd.f32 %v498_v58, %v407_v56 }
 0x141   : > { %v1551_v59 = vpop.f32.mrf.mxu1 }
 0x143   : > { %v578_v60 = vpop.f32.mrf.mxu0 }
 0x144   : > { %v579_v13 = vadd.f32 %v578_v60, %v499_v10 }
 0x145   : > { %v1562_v61 = vpop.f32.mrf.mxu0 }
 0x14a   : > { %v655_v62 = vpop.f32.mrf.mxu1 }
 0x14b   : > { %v656_v15 = vadd.f32 %v655_v62, %v579_v13 }
 0x14c   : > { %v1573_v63 = vpop.f32.mrf.mxu1 }
 0x14d   : > { %v738_v1 = vpop.f32.mrf.mxu0 }
 0x14e   : > { %v739_v20 = vadd.f32 %v738_v1, %v656_v15 }
 0x14f   : > { %v1584_v2 = vpop.f32.mrf.mxu0 }
 0x154   : > { %v813_v3 = vpop.f32.mrf.mxu1 }
 0x155   : > { %v814_v21 = vadd.f32 %v813_v3, %v739_v20 }
 0x156   : > { %v1595_v4 = vpop.f32.mrf.mxu1 }
 0x157   : > { %v1307_v28 = vmul.f32 %v1306_v23, %v814_v21 }
 0x158   : > { %v896_v5 = vpop.f32.mrf.mxu0 }
 0x15a   : > { %v1606_v6 = vpop.f32.mrf.mxu0 }
 0x15e   : > { %v987_v7 = vpop.f32.mrf.mxu1 }
 0x15f   : > { %v988_v11 = vadd.f32 %v987_v7, %v896_v5 }
 0x160   : > { %v1617_v0 = vpop.f32.mrf.mxu1 }
 0x161   : > { %v1067_v8 = vpop.f32.mrf.mxu0 }
 0x162   : > { %v1068_v16 = vadd.f32 %v1067_v8, %v988_v11 }
 0x163   : > { %v1628_v9 = vpop.f32.mrf.mxu0 }
 0x168   : > { %v1144_v12 = vpop.f32.mrf.mxu1 }
 0x169   : > { %v1145_v18 = vadd.f32 %v1144_v12, %v1068_v16 }
 0x16a   : > { %v1639_v14 = vpop.f32.mrf.mxu1 }
 0x16b   : > { %v1227_v17 = vpop.f32.mrf.mxu0 }
 0x16c   : > { %v1228_v22 = vadd.f32 %v1227_v17, %v1145_v18 }
 0x16d   : > { %v1650_v19 = vpop.f32.mrf.mxu0 }
 0x171   : > { %v1302_v24 = vpop.f32.mrf.mxu1 }
 0x172   : > { %v1303_v26 = vadd.f32 %v1302_v24, %v1228_v22 }
 0x173   : > { %v1661_v27 = vpop.f32.mrf.mxu1 }
 0x174   : > { %v1309_v29 = vmul.f32 %v1308_v25, %v1303_v26 }
 0x176   : > { %v1310_v30 = vadd.f32 %v1309_v29, %v1307_v28 }
 0x178   : > { %1311 = vst.msk [vmem:[%s322_s11] sm:$0xff] %vm328_vm1, %v1310_v30 }
 0x179   : > { %1914 = shalt.err (!%p1911_p9)
}
 0x17a   : > { %s1915_s17 = scalar_lea.hbm %s1325_s6, 128  ;;  %s1919_s1 = scalar_lea.hbm %s2428_s5, 1024 }
 0x17b   : > { %p1916_p7 = scmp.ne.s32.totalorder %s1325_s6, %s1915_s17  ;;  %p1920_p1 = scmp.lt.s32.totalorder %s1325_s6, %s2428_s5 }
 0x17c   : > { %p1921_p11 = scmp.lt.s32.totalorder %s1919_s1, %s1915_s17 }
 0x17d   : > { %p1917_p12 = pnand %p1916_p7, %p2149_p3 }
 0x17e   : > { %p1922_p6 = por %p1921_p11, %p1920_p1 }
 0x17f   : > { %p1918_p13 = pneg %p1917_p12 }
 0x181   : > { %p1923_p4 = pnand %p1922_p6, %p1918_p13 }
 0x183   : > { %1926 = shalt.err (!%p1923_p4)
}
 0x184   : > { %1680 = dma.vmem_to_hbm [thread:$0]  (%p2149_p3), %s1328_s27, 128, %s1325_s6, %s1313_s8  }
 0x185 PF: > { %p1712_p2 = scmp.ge.s32.totalorder %s1993_s23, 2  ;;  %s1339_s14 = sand.u32 1, %s1973_s18  }
 0x186   : > { %s1340_s24 = scalar_lea.sflag [#allocation4], %s1339_s14 }
 0x187   : > { %p1700_p0 = pnand %p1712_p2, %p2158_p10 }
 0x189   : > { %p1701_p5 = pneg %p1700_p0 }
 0x18b   : > { %1968 = dma.done.wait (%p1701_p5), %s1340_s24, 128  }
 0x18c   : > { %1970 = vsyncadd (%p1701_p5), %s1340_s24, 4294967168  ;;  %s21_s23 = sadd.s32 1, %s1993_s23   ;;  %s2451_s18 = smov %s1977_s19 }
 0x18d   : > { %p18_p8 = scmp.ge.s32.totalorder %s21_s23, 10   ;;  %s2452_s19 = smov %s1981_s20 }
 0x18e   : > { %s2453_s20 = smov %s2156_s15  ;;  %s2454_s21 = smov %s1989_s22 }
 0x18f   : > { %s2455_s22 = smov %s2457_s30  ;;  %20 = sbr.rel (!%p18_p8) target bundleno = 10 (0xa), region = 102 }
 0x194   :  { %1345 = vsyncpa [#allocation3], 1 }
 0x195   :  { %1347 = vsyncpa [#allocation3 + $0x1], 1 }
 0x196   :  { %1348 = vsyncpa [#allocation6], 1 }
 0x197   :  { %1349 = vsyncpa [#allocation9], 1 }
 0x198   :  { %1350 = vsyncpa [#allocation4], 1 }
 0x199   :  { %1352 = vsyncpa [#allocation4 + $0x1], 1 }

</bundles_post_ra>
